<compile_context>
chip_gen: v7x
topology: tpu7x:2x2x1
jax: 0.10.0
libtpu: 0.0.40
codegen_flags: <defaults>
</compile_context>

<pallas_src>
import jax
import jax.numpy as jnp
from jax import lax
from jax.experimental import pallas as pl
from jax.experimental.pallas import tpu as pltpu

EMBEDDING_SIZE = 32
HIDDEN_LAYERS = (64, 32, 16, 8)
OUTPUT_RANGE = (1, 5)
NORM_MIN = float(min(OUTPUT_RANGE))
NORM_RANGE = float(abs(OUTPUT_RANGE[0] - OUTPUT_RANGE[1]) + 1)


def _round_up(x, m):
    return (x + m - 1) // m * m


def _ncf_kernel(uid_ref, mid_ref, utab_ref, mtab_ref,
                w1u_ref, w1m_ref, b1_ref,
                w2_ref, b2_ref,
                w3_ref, b3_ref,
                w4_ref, b4_ref,
                o_ref):
    """One batch tile. Everything is (features, TB): batch on the lane axis."""
    vu = utab_ref.shape[1]          # user vocab
    vm = mtab_ref.shape[1]          # movie vocab
    tb = uid_ref.shape[1]           # batch tile (lane axis)

    # ---- fused embedding gather (exact: one-hot rows are 0.0 / 1.0) -------
    onehot_u = (lax.broadcasted_iota(jnp.int32, (vu, tb), 0)
                == uid_ref[...]).astype(jnp.float32)            # (Vu, TB)
    onehot_m = (lax.broadcasted_iota(jnp.int32, (vm, tb), 0)
                == mid_ref[...]).astype(jnp.float32)            # (Vm, TB)
    u_t = jnp.dot(utab_ref[...], onehot_u,
                  preferred_element_type=jnp.float32)           # (E, TB)
    m_t = jnp.dot(mtab_ref[...], onehot_m,
                  preferred_element_type=jnp.float32)           # (E, TB)

    # ---- layer 1: Linear(64,32)+ReLU, concat-free (w1 pre-split) ----------
    h = jnp.dot(w1u_ref[...], u_t, preferred_element_type=jnp.float32)
    h = h + jnp.dot(w1m_ref[...], m_t, preferred_element_type=jnp.float32)
    h = jnp.maximum(h + b1_ref[...], 0.0)                       # (32, TB)

    # ---- layer 2: Linear(32,16)+ReLU ---------------------------------------
    h = jnp.dot(w2_ref[...], h, preferred_element_type=jnp.float32)
    h = jnp.maximum(h + b2_ref[...], 0.0)                       # (16, TB)

    # ---- layer 3: Linear(16,8)+ReLU ----------------------------------------
    h = jnp.dot(w3_ref[...], h, preferred_element_type=jnp.float32)
    h = jnp.maximum(h + b3_ref[...], 0.0)                       # (8, TB)

    # ---- layer 4: Linear(8,1)+Sigmoid on VPU/XLU (no M=1 MXU push) ---------
    y = jnp.sum(w4_ref[...] * h, axis=0, keepdims=True) + b4_ref[...]  # (1, TB)
    y = jax.nn.sigmoid(y)

    # lane-dense output store + renormalization
    o_ref[...] = y * NORM_RANGE + NORM_MIN


def ncf_forward(user_id, movie_id, params, *, block_batch=1024):
    """Full forward pass; whole model (gather + MLP) runs inside one kernel."""
    assert block_batch % 128 == 0
    uemb = params["user_embedding"]                  # (Vu, E)
    memb = params["movie_embedding"]                 # (Vm, E)
    vu, emb = uemb.shape
    vm = memb.shape[0]

    # hashing (matches torch: id % vocab) — trivial int op on (B,) ids
    uid = user_id.astype(jnp.int32) % vu
    mid = movie_id.astype(jnp.int32) % vm

    b = uid.shape[0]
    tb = min(block_batch, _round_up(b, 128))
    bp = _round_up(b, tb)
    pad = bp - b
    uid = jnp.pad(uid, (0, pad)).reshape(1, bp)      # pad rows use valid id 0
    mid = jnp.pad(mid, (0, pad)).reshape(1, bp)

    # transposed / pre-split parameters (tiny tensors; done once per call)
    utab_t = uemb.T                                  # (E, Vu)
    mtab_t = memb.T                                  # (E, Vm)
    w1 = params["w1"]                                # (32, 64) torch (out,in)
    w1u, w1m = w1[:, :emb], w1[:, emb:]              # (32,32), (32,32)
    b1 = params["b1"].reshape(-1, 1)                 # (32, 1)
    w2 = params["w2"]                                # (16, 32)
    b2 = params["b2"].reshape(-1, 1)                 # (16, 1)
    w3 = params["w3"]                                # (8, 16)
    b3 = params["b3"].reshape(-1, 1)                 # (8, 1)
    w4 = params["w4"].T                              # (8, 1)
    b4 = params["b4"].reshape(1, 1)                  # (1, 1)

    num_tiles = bp // tb

    def const_spec(arr):
        # full-array block, resident across all grid steps
        return pl.BlockSpec(arr.shape, lambda i: (0, 0))

    tile_spec = pl.BlockSpec((1, tb), lambda i: (0, i))

    out = pl.pallas_call(
        _ncf_kernel,
        out_shape=jax.ShapeDtypeStruct((1, bp), jnp.float32),
        grid=(num_tiles,),
        in_specs=[
            tile_spec,                 # uid
            tile_spec,                 # mid
            const_spec(utab_t), const_spec(mtab_t),
            const_spec(w1u), const_spec(w1m), const_spec(b1),
            const_spec(w2), const_spec(b2),
            const_spec(w3), const_spec(b3),
            const_spec(w4), const_spec(b4),
        ],
        out_specs=tile_spec,
        compiler_params=pltpu.CompilerParams(
            dimension_semantics=("parallel",)),      # megacore-shardable
    )(uid, mid, utab_t, mtab_t, w1u, w1m, b1, w2, b2, w3, b3, w4, b4)

    return out.reshape(bp, 1)[:b]                    # drop padded tail


# ------------------------- params / reference ------------------------------

def _xavier_uniform(key, fan_out, fan_in):
    limit = (6.0 / (fan_in + fan_out)) ** 0.5
    return jax.random.uniform(key, (fan_out, fan_in), jnp.float32, -limit, limit)


def init_params(key, user_count, movie_count, embedding_size=EMBEDDING_SIZE,
                hidden_layers=HIDDEN_LAYERS):
    assert embedding_size * 2 == hidden_layers[0]
    keys = jax.random.split(key, 6)
    return {
        "user_embedding": jax.random.uniform(
            keys[0], (user_count, embedding_size), jnp.float32, -0.05, 0.05),
        "movie_embedding": jax.random.uniform(
            keys[1], (movie_count, embedding_size), jnp.float32, -0.05, 0.05),
        # torch Linear layout: weight (out, in), bias (out,), bias filled 0.01
        "w1": _xavier_uniform(keys[2], hidden_layers[1], hidden_layers[0]),
        "b1": jnp.full((hidden_layers[1],), 0.01, jnp.float32),
        "w2": _xavier_uniform(keys[3], hidden_layers[2], hidden_layers[1]),
        "b2": jnp.full((hidden_layers[2],), 0.01, jnp.float32),
        "w3": _xavier_uniform(keys[4], hidden_layers[3], hidden_layers[2]),
        "b3": jnp.full((hidden_layers[3],), 0.01, jnp.float32),
        "w4": _xavier_uniform(keys[5], 1, hidden_layers[3]),
        "b4": jnp.full((1,), 0.01, jnp.float32),
    }


def _reference_forward(user_id, movie_id, params):
    """Pure-JAX reference for correctness check."""
    uc = params["user_embedding"].shape[0]
    mc = params["movie_embedding"].shape[0]
    u = params["user_embedding"][user_id % uc]
    m = params["movie_embedding"][movie_id % mc]
    x = jnp.concatenate([u, m], axis=1)
    x = jnp.maximum(x @ params["w1"].T + params["b1"], 0.0)
    x = jnp.maximum(x @ params["w2"].T + params["b2"], 0.0)
    x = jnp.maximum(x @ params["w3"].T + params["b3"], 0.0)
    x = jax.nn.sigmoid(x @ params["w4"].T + params["b4"])
    return x * NORM_RANGE + NORM_MIN


if __name__ == "__main__":
    key = jax.random.PRNGKey(0)
    pkey, ukey, mkey = jax.random.split(key, 3)

    user_count = 64     # synthetic small vocab sizes
    movie_count = 128
    batch = 8

    params = init_params(pkey, user_count, movie_count)
    user_id = jax.random.randint(ukey, (batch,), 0, 10_000, dtype=jnp.int32)
    movie_id = jax.random.randint(mkey, (batch,), 0, 10_000, dtype=jnp.int32)

    fwd = jax.jit(ncf_forward)
    out = jax.block_until_ready(fwd(user_id, movie_id, params))

    ref = _reference_forward(user_id, movie_id, params)
    assert out.shape == (batch, 1)
    assert jnp.allclose(out, ref, atol=1e-4, rtol=1e-4), \
        float(jnp.max(jnp.abs(out - ref)))

    print("KERNEL_OK")
</pallas_src>

<mosaic_0001>
module attributes {stable_mosaic.version = 11 : i64} {
  func.func @_ncf_kernel(%arg0: i32, %arg1: memref<1x128xi32, #tpu.memory_space<vmem>>, %arg2: memref<1x128xi32, #tpu.memory_space<vmem>>, %arg3: memref<32x64xf32, #tpu.memory_space<vmem>>, %arg4: memref<32x128xf32, #tpu.memory_space<vmem>>, %arg5: memref<32x32xf32, #tpu.memory_space<vmem>>, %arg6: memref<32x32xf32, #tpu.memory_space<vmem>>, %arg7: memref<32x1xf32, #tpu.memory_space<vmem>>, %arg8: memref<16x32xf32, #tpu.memory_space<vmem>>, %arg9: memref<16x1xf32, #tpu.memory_space<vmem>>, %arg10: memref<8x16xf32, #tpu.memory_space<vmem>>, %arg11: memref<8x1xf32, #tpu.memory_space<vmem>>, %arg12: memref<8x1xf32, #tpu.memory_space<vmem>>, %arg13: memref<1x1xf32, #tpu.memory_space<vmem>>, %arg14: memref<1x128xf32, #tpu.memory_space<vmem>>) attributes {dimension_semantics = [#tpu.dimension_semantics<parallel>], iteration_bounds = array<i64: 1>, scalar_prefetch = 0 : i64, scratch_operands = 0 : i64, tpu.core_type = #tpu.core_type<tc>, window_params = [{transform_indices = @transform_0, window_bounds = array<i64: 1, 128>}, {transform_indices = @transform_1, window_bounds = array<i64: 1, 128>}, {pipeline_mode = #tpu.pipeline_mode<synchronous>, transform_indices = @transform_2, window_bounds = array<i64: 32, 64>}, {pipeline_mode = #tpu.pipeline_mode<synchronous>, transform_indices = @transform_3, window_bounds = array<i64: 32, 128>}, {pipeline_mode = #tpu.pipeline_mode<synchronous>, transform_indices = @transform_4, window_bounds = array<i64: 32, 32>}, {pipeline_mode = #tpu.pipeline_mode<synchronous>, transform_indices = @transform_5, window_bounds = array<i64: 32, 32>}, {pipeline_mode = #tpu.pipeline_mode<synchronous>, transform_indices = @transform_6, window_bounds = array<i64: 32, 1>}, {pipeline_mode = #tpu.pipeline_mode<synchronous>, transform_indices = @transform_7, window_bounds = array<i64: 16, 32>}, {pipeline_mode = #tpu.pipeline_mode<synchronous>, transform_indices = @transform_8, window_bounds = array<i64: 16, 1>}, {pipeline_mode = #tpu.pipeline_mode<synchronous>, transform_indices = @transform_9, window_bounds = array<i64: 8, 16>}, {pipeline_mode = #tpu.pipeline_mode<synchronous>, transform_indices = @transform_10, window_bounds = array<i64: 8, 1>}, {pipeline_mode = #tpu.pipeline_mode<synchronous>, transform_indices = @transform_11, window_bounds = array<i64: 8, 1>}, {pipeline_mode = #tpu.pipeline_mode<synchronous>, transform_indices = @transform_12, window_bounds = array<i64: 1, 1>}, {transform_indices = @transform_13, window_bounds = array<i64: 1, 128>}]} {
    %0 = tpu.iota {dimensions = array<i32: 0>} : vector<64x128xi32>
    %c0 = arith.constant 0 : index
    %c0_0 = arith.constant 0 : index
    %1 = vector.load %arg1[%c0, %c0_0] : memref<1x128xi32, #tpu.memory_space<vmem>>, vector<1x128xi32>
    %2 = vector.broadcast %1 : vector<1x128xi32> to vector<64x128xi32>
    %3 = arith.cmpi eq, %0, %2 : vector<64x128xi32>
    %4 = arith.extui %3 : vector<64x128xi1> to vector<64x128xi32>
    %5 = arith.sitofp %4 : vector<64x128xi32> to vector<64x128xf32>
    %6 = tpu.iota {dimensions = array<i32: 0>} : vector<128x128xi32>
    %c0_1 = arith.constant 0 : index
    %c0_2 = arith.constant 0 : index
    %7 = vector.load %arg2[%c0_1, %c0_2] : memref<1x128xi32, #tpu.memory_space<vmem>>, vector<1x128xi32>
    %8 = vector.broadcast %7 : vector<1x128xi32> to vector<128x128xi32>
    %9 = arith.cmpi eq, %6, %8 : vector<128x128xi32>
    %10 = arith.extui %9 : vector<128x128xi1> to vector<128x128xi32>
    %11 = arith.sitofp %10 : vector<128x128xi32> to vector<128x128xf32>
    %c0_3 = arith.constant 0 : index
    %c0_4 = arith.constant 0 : index
    %12 = vector.load %arg3[%c0_3, %c0_4] : memref<32x64xf32, #tpu.memory_space<vmem>>, vector<32x64xf32>
    %cst = arith.constant dense<0.000000e+00> : vector<32x128xf32>
    %13 = tpu.matmul %12, %5, %cst {dimension_numbers = #tpu.dot_dimension_numbers<[1], [0], [0], [1], [0, 0, 1, 1], [], []>} : vector<32x64xf32>, vector<64x128xf32>, vector<32x128xf32> -> vector<32x128xf32>
    %c0_5 = arith.constant 0 : index
    %c0_6 = arith.constant 0 : index
    %14 = vector.load %arg4[%c0_5, %c0_6] : memref<32x128xf32, #tpu.memory_space<vmem>>, vector<32x128xf32>
    %cst_7 = arith.constant dense<0.000000e+00> : vector<32x128xf32>
    %15 = tpu.matmul %14, %11, %cst_7 {dimension_numbers = #tpu.dot_dimension_numbers<[1], [0], [0], [1], [0, 0, 1, 1], [], []>} : vector<32x128xf32>, vector<128x128xf32>, vector<32x128xf32> -> vector<32x128xf32>
    %c0_8 = arith.constant 0 : index
    %c0_9 = arith.constant 0 : index
    %16 = vector.load %arg5[%c0_8, %c0_9] : memref<32x32xf32, #tpu.memory_space<vmem>>, vector<32x32xf32>
    %cst_10 = arith.constant dense<0.000000e+00> : vector<32x128xf32>
    %17 = tpu.matmul %16, %13, %cst_10 {dimension_numbers = #tpu.dot_dimension_numbers<[1], [0], [0], [1], [0, 0, 1, 1], [], []>} : vector<32x32xf32>, vector<32x128xf32>, vector<32x128xf32> -> vector<32x128xf32>
    %c0_11 = arith.constant 0 : index
    %c0_12 = arith.constant 0 : index
    %18 = vector.load %arg6[%c0_11, %c0_12] : memref<32x32xf32, #tpu.memory_space<vmem>>, vector<32x32xf32>
    %cst_13 = arith.constant dense<0.000000e+00> : vector<32x128xf32>
    %19 = tpu.matmul %18, %15, %cst_13 {dimension_numbers = #tpu.dot_dimension_numbers<[1], [0], [0], [1], [0, 0, 1, 1], [], []>} : vector<32x32xf32>, vector<32x128xf32>, vector<32x128xf32> -> vector<32x128xf32>
    %20 = arith.addf %17, %19 : vector<32x128xf32>
    %c0_14 = arith.constant 0 : index
    %c0_15 = arith.constant 0 : index
    %21 = vector.load %arg7[%c0_14, %c0_15] : memref<32x1xf32, #tpu.memory_space<vmem>>, vector<32x1xf32>
    %22 = vector.broadcast %21 : vector<32x1xf32> to vector<32x128xf32>
    %23 = arith.addf %20, %22 : vector<32x128xf32>
    %cst_16 = arith.constant 0.000000e+00 : f32
    %24 = vector.broadcast %cst_16 : f32 to vector<32x128xf32>
    %25 = arith.maximumf %23, %24 : vector<32x128xf32>
    %c0_17 = arith.constant 0 : index
    %c0_18 = arith.constant 0 : index
    %26 = vector.load %arg8[%c0_17, %c0_18] : memref<16x32xf32, #tpu.memory_space<vmem>>, vector<16x32xf32>
    %cst_19 = arith.constant dense<0.000000e+00> : vector<16x128xf32>
    %27 = tpu.matmul %26, %25, %cst_19 {dimension_numbers = #tpu.dot_dimension_numbers<[1], [0], [0], [1], [0, 0, 1, 1], [], []>} : vector<16x32xf32>, vector<32x128xf32>, vector<16x128xf32> -> vector<16x128xf32>
    %c0_20 = arith.constant 0 : index
    %c0_21 = arith.constant 0 : index
    %28 = vector.load %arg9[%c0_20, %c0_21] : memref<16x1xf32, #tpu.memory_space<vmem>>, vector<16x1xf32>
    %29 = vector.broadcast %28 : vector<16x1xf32> to vector<16x128xf32>
    %30 = arith.addf %27, %29 : vector<16x128xf32>
    %cst_22 = arith.constant 0.000000e+00 : f32
    %31 = vector.broadcast %cst_22 : f32 to vector<16x128xf32>
    %32 = arith.maximumf %30, %31 : vector<16x128xf32>
    %c0_23 = arith.constant 0 : index
    %c0_24 = arith.constant 0 : index
    %33 = vector.load %arg10[%c0_23, %c0_24] : memref<8x16xf32, #tpu.memory_space<vmem>>, vector<8x16xf32>
    %cst_25 = arith.constant dense<0.000000e+00> : vector<8x128xf32>
    %34 = tpu.matmul %33, %32, %cst_25 {dimension_numbers = #tpu.dot_dimension_numbers<[1], [0], [0], [1], [0, 0, 1, 1], [], []>} : vector<8x16xf32>, vector<16x128xf32>, vector<8x128xf32> -> vector<8x128xf32>
    %c0_26 = arith.constant 0 : index
    %c0_27 = arith.constant 0 : index
    %35 = vector.load %arg11[%c0_26, %c0_27] : memref<8x1xf32, #tpu.memory_space<vmem>>, vector<8x1xf32>
    %36 = vector.broadcast %35 : vector<8x1xf32> to vector<8x128xf32>
    %37 = arith.addf %34, %36 : vector<8x128xf32>
    %cst_28 = arith.constant 0.000000e+00 : f32
    %38 = vector.broadcast %cst_28 : f32 to vector<8x128xf32>
    %39 = arith.maximumf %37, %38 : vector<8x128xf32>
    %c0_29 = arith.constant 0 : index
    %c0_30 = arith.constant 0 : index
    %40 = vector.load %arg12[%c0_29, %c0_30] : memref<8x1xf32, #tpu.memory_space<vmem>>, vector<8x1xf32>
    %41 = vector.broadcast %40 : vector<8x1xf32> to vector<8x128xf32>
    %42 = arith.mulf %41, %39 : vector<8x128xf32>
    %cst_31 = arith.constant dense<0.000000e+00> : vector<128xf32>
    %43 = vector.multi_reduction <add>, %42, %cst_31 [0] : vector<8x128xf32> to vector<128xf32>
    %44 = vector.shape_cast %43 : vector<128xf32> to vector<1x128xf32>
    %c0_32 = arith.constant 0 : index
    %c0_33 = arith.constant 0 : index
    %45 = vector.load %arg13[%c0_32, %c0_33] : memref<1x1xf32, #tpu.memory_space<vmem>>, vector<1x1xf32>
    %46 = vector.broadcast %45 : vector<1x1xf32> to vector<1x128xf32>
    %47 = arith.addf %44, %46 : vector<1x128xf32>
    %48 = arith.negf %47 : vector<1x128xf32>
    %49 = math.exp %48 : vector<1x128xf32>
    %cst_34 = arith.constant 1.000000e+00 : f32
    %50 = vector.broadcast %cst_34 : f32 to vector<1x128xf32>
    %51 = arith.addf %50, %49 : vector<1x128xf32>
    %52 = arith.divf %50, %51 : vector<1x128xf32>
    %cst_35 = arith.constant 5.000000e+00 : f32
    %53 = vector.broadcast %cst_35 : f32 to vector<1x128xf32>
    %54 = arith.mulf %52, %53 : vector<1x128xf32>
    %cst_36 = arith.constant 1.000000e+00 : f32
    %55 = vector.broadcast %cst_36 : f32 to vector<1x128xf32>
    %56 = arith.addf %54, %55 : vector<1x128xf32>
    %c0_37 = arith.constant 0 : index
    %c0_38 = arith.constant 0 : index
    %57 = vector.load %arg14[%c0_37, %c0_38] : memref<1x128xf32, #tpu.memory_space<vmem>>, vector<1x128xf32>
    tpu.vector_store %arg14[%c0_37, %c0_38], %56 {strides = array<i32>} : memref<1x128xf32, #tpu.memory_space<vmem>>, vector<1x128xf32>,
    return
  }
  func.func @transform_0(%arg0: i32) -> (i32, i32) {
    %c0_i32 = arith.constant 0 : i32
    %c0_i32_0 = arith.constant 0 : i32
    return %c0_i32, %arg0 : i32, i32
  }
  func.func @transform_1(%arg0: i32) -> (i32, i32) {
    %c0_i32 = arith.constant 0 : i32
    %c0_i32_0 = arith.constant 0 : i32
    return %c0_i32, %arg0 : i32, i32
  }
  func.func @transform_2(%arg0: i32) -> (i32, i32) {
    %c0_i32 = arith.constant 0 : i32
    %c0_i32_0 = arith.constant 0 : i32
    %c0_i32_1 = arith.constant 0 : i32
    return %c0_i32, %c0_i32_0 : i32, i32
  }
  func.func @transform_3(%arg0: i32) -> (i32, i32) {
    %c0_i32 = arith.constant 0 : i32
    %c0_i32_0 = arith.constant 0 : i32
    %c0_i32_1 = arith.constant 0 : i32
    return %c0_i32, %c0_i32_0 : i32, i32
  }
  func.func @transform_4(%arg0: i32) -> (i32, i32) {
    %c0_i32 = arith.constant 0 : i32
    %c0_i32_0 = arith.constant 0 : i32
    %c0_i32_1 = arith.constant 0 : i32
    return %c0_i32, %c0_i32_0 : i32, i32
  }
  func.func @transform_5(%arg0: i32) -> (i32, i32) {
    %c0_i32 = arith.constant 0 : i32
    %c0_i32_0 = arith.constant 0 : i32
    %c0_i32_1 = arith.constant 0 : i32
    return %c0_i32, %c0_i32_0 : i32, i32
  }
  func.func @transform_6(%arg0: i32) -> (i32, i32) {
    %c0_i32 = arith.constant 0 : i32
    %c0_i32_0 = arith.constant 0 : i32
    %c0_i32_1 = arith.constant 0 : i32
    return %c0_i32, %c0_i32_0 : i32, i32
  }
  func.func @transform_7(%arg0: i32) -> (i32, i32) {
    %c0_i32 = arith.constant 0 : i32
    %c0_i32_0 = arith.constant 0 : i32
    %c0_i32_1 = arith.constant 0 : i32
    return %c0_i32, %c0_i32_0 : i32, i32
  }
  func.func @transform_8(%arg0: i32) -> (i32, i32) {
    %c0_i32 = arith.constant 0 : i32
    %c0_i32_0 = arith.constant 0 : i32
    %c0_i32_1 = arith.constant 0 : i32
    return %c0_i32, %c0_i32_0 : i32, i32
  }
  func.func @transform_9(%arg0: i32) -> (i32, i32) {
    %c0_i32 = arith.constant 0 : i32
    %c0_i32_0 = arith.constant 0 : i32
    %c0_i32_1 = arith.constant 0 : i32
    return %c0_i32, %c0_i32_0 : i32, i32
  }
  func.func @transform_10(%arg0: i32) -> (i32, i32) {
    %c0_i32 = arith.constant 0 : i32
    %c0_i32_0 = arith.constant 0 : i32
    %c0_i32_1 = arith.constant 0 : i32
    return %c0_i32, %c0_i32_0 : i32, i32
  }
  func.func @transform_11(%arg0: i32) -> (i32, i32) {
    %c0_i32 = arith.constant 0 : i32
    %c0_i32_0 = arith.constant 0 : i32
    %c0_i32_1 = arith.constant 0 : i32
    return %c0_i32, %c0_i32_0 : i32, i32
  }
  func.func @transform_12(%arg0: i32) -> (i32, i32) {
    %c0_i32 = arith.constant 0 : i32
    %c0_i32_0 = arith.constant 0 : i32
    %c0_i32_1 = arith.constant 0 : i32
    return %c0_i32, %c0_i32_0 : i32, i32
  }
  func.func @transform_13(%arg0: i32) -> (i32, i32) {
    %c0_i32 = arith.constant 0 : i32
    %c0_i32_0 = arith.constant 0 : i32
    return %c0_i32, %arg0 : i32, i32
  }
}

</mosaic_0001>

<bundles_post_ra>
// kernel: ncf_forward.1
= control target key start
LH: loop header
LB: loop body
LE: loop exit
PB: predicated region body
PF: predicated region fallthrough
CT: control target
= control target key end

     0   :  { %v46_v0 = vlaneseq  ;;  %vm149_vm0 = vcmask 523264   ;;  %v1106_v13 = vmov 1.0|1.0   ;;  %v1107_v33 = vmov 0   ;;  %s1382_s1 = inlined_call_operand.vmem [shape: s32[1,128], index: 1, kind: input, shape index: {}]   ;;  %s1383_s3 = inlined_call_operand.vmem [shape: f32[32,128], index: 3, kind: input, shape index: {}]   ;;  %s1384_s2 = inlined_call_operand.vmem [shape: f32[32,64], index: 2, kind: input, shape index: {}]   ;;  %s1385_s0 = inlined_call_operand.vmem [shape: s32[1,128], index: 0, kind: input, shape index: {}]   ;;  %s1386_s5 = inlined_call_operand.vmem [shape: f32[32,32], index: 5, kind: input, shape index: {}]   ;;  %s1387_s6 = inlined_call_operand.vmem [shape: f32[32,1], index: 6, kind: input, shape index: {}]   ;;  %s1388_s12 = inlined_call_operand.<no memory space> [shape: f32[1,1], index: 12, kind: input, shape index: {}]   ;;  %s1389_s8 = inlined_call_operand.vmem [shape: f32[16,1], index: 8, kind: input, shape index: {}]   ;;  %s1390_s10 = inlined_call_operand.vmem [shape: f32[8,1], index: 10, kind: input, shape index: {}]   ;;  %s1391_s11 = inlined_call_operand.vmem [shape: f32[8,1], index: 11, kind: input, shape index: {}]   ;;  %s1392_s4 = inlined_call_operand.vmem [shape: f32[32,32], index: 4, kind: input, shape index: {}]   ;;  %s1393_s7 = inlined_call_operand.vmem [shape: f32[16,32], index: 7, kind: input, shape index: {}]   ;;  %s1394_s9 = inlined_call_operand.vmem [shape: f32[8,16], index: 9, kind: input, shape index: {}]   ;;  %s1395_s13 = inlined_call_operand.vmem [shape: f32[1,128], index: 13, kind: output, shape index: {}]  }
   0x1   :  { %v1184_v1 = vld [vmem:[%s1382_s1] ss:$0 sm:$0xff]  ;;  %v146_v26 = vld [vmem:[%s1384_s2 + $0x8] sm:$0xff]  ;;  %v147_v27 = vld [vmem:[%s1384_s2 + $0x10] sm:$0xff]  ;;  %1100 = vset.pattern.permute.xlu0 %v1107_v33  ;;  %1101 = vset.pattern.permute.xlu1 %v1107_v33  ;;  %v18_v36 = vstv %s1388_s12  ;;  %v1108_v20 = vmov 0.0|0.0   ;;  %v1110_v21 = vmov 0.0  }
   0x2   :  { %v247_v2 = vld [vmem:[%s1383_s3] sm:$0xff]  ;;  %v1189_v3 = vshrl.u32 %v46_v0, 7  ;;  %v148_v28 = vld [vmem:[%s1384_s2 + $0x18] sm:$0xff]  ;;  %v248_v29 = vld [vmem:[%s1383_s3 + $0x8] sm:$0xff]  ;;  %19 = vst [vmem:[#allocation2] sm:$0x1] %v18_v36 }
   0x3   :  { %964 = vmatprep.mubr.f32.mxu1 %v247_v2  ;;  %v145_v4 = vld [vmem:[%s1384_s2] sm:$0xff]  ;;  %v249_v30 = vld [vmem:[%s1383_s3 + $0x10] sm:$0xff]  ;;  %v250_v31 = vld [vmem:[%s1383_s3 + $0x18] sm:$0xff] }
   0x4   :  { %v48_v5 = vadd.s32 8, %v1189_v3  ;;  %vm97_vm1 = vcmp.eq.s32.totalorder %v1189_v3, %v1184_v1  ;;  %v49_v6 = vadd.s32 16, %v1189_v3  ;;  %v50_v7 = vadd.s32 24, %v1189_v3  ;;  %926 = vmatprep.mubr.msk.f32.mxu0 %vm149_vm0, %v145_v4  ;;  %v787_v12 = vld [vmem:[%s1385_s0] ss:$0 sm:$0xff]  ;;  %v541_v35 = vld [vmem:[%s1387_s6 + $0x10] sm:$0xff] }
   0x5   :  { %v51_v8 = vadd.s32 32, %v1189_v3  ;;  %v52_v9 = vadd.s32 40, %v1189_v3  ;;  %v53_v10 = vadd.s32 48, %v1189_v3  ;;  %v54_v11 = vadd.s32 56, %v1189_v3  ;;  %v340_v32 = vld [vmem:[%s1386_s5] sm:$0xff]  ;;  %555 = vperm.xlu1 %1101, %v541_v35   ;;  %v540_v37 = vld [vmem:[%s1387_s6 + $0x8] sm:$0xff] }
   0x6   :  { %vm98_vm2 = vcmp.eq.s32.totalorder %v48_v5, %v1184_v1  ;;  %vm99_vm3 = vcmp.eq.s32.totalorder %v49_v6, %v1184_v1  ;;  %vm100_vm4 = vcmp.eq.s32.totalorder %v50_v7, %v1184_v1  ;;  %vm60_vm9 = vcmp.eq.s32.totalorder %v1189_v3, %v787_v12  ;;  %v539_v34 = vld [vmem:[%s1387_s6] sm:$0xff]  ;;  %v542_v38 = vld [vmem:[%s1387_s6 + $0x18] sm:$0xff]  ;;  %v574_v40 = vld [vmem:[%s1389_s8 + $0x8] sm:$0xff] }
   0x7   :  { %vm1032_vm5 = vmpackc.low %vm98_vm2, %vm97_vm1  ;;  %vm101_vm7 = vcmp.eq.s32.totalorder %v51_v8, %v1184_v1  ;;  %vm102_vm8 = vcmp.eq.s32.totalorder %v52_v9, %v1184_v1  ;;  %vm61_vm10 = vcmp.eq.s32.totalorder %v48_v5, %v787_v12  ;;  %vm103_vm12 = vcmp.eq.s32.totalorder %v53_v10, %v1184_v1  ;;  %545 = vperm.xlu0 %1100, %v539_v34   ;;  %v573_v39 = vld [vmem:[%s1389_s8] sm:$0xff]  ;;  %v341_v56 = vld [vmem:[%s1386_s5 + $0x8] sm:$0xff] }
   0x8   :  { %1033 = vmatprep.subr.msk.bf16.mxu1 %vm1032_vm5, %v1106_v13  ;;  %vm1036_vm6 = vmpackc.low %vm100_vm4, %vm99_vm3  ;;  %vm104_vm13 = vcmp.eq.s32.totalorder %v54_v11, %v1184_v1  ;;  %v84_v15 = vadd.s32 64, %v1189_v3  ;;  %v85_v16 = vadd.s32 72, %v1189_v3  ;;  %vm62_vm14 = vcmp.eq.s32.totalorder %v49_v6, %v787_v12  ;;  %v669_v41 = vld [vmem:[%s1390_s10] sm:$0xff]  ;;  %v342_v57 = vld [vmem:[%s1386_s5 + $0x10] sm:$0xff] }
   0x9   :  { %1035 = vmatpush3.bf16.msk.msra.mxu1 %vm1032_vm5, %v1106_v13  ;;  %vm1216_vm11 = vmpackc.low %vm102_vm8, %vm101_vm7  ;;  %vm63_vm15 = vcmp.eq.s32.totalorder %v50_v7, %v787_v12  ;;  %vm64_vm3 = vcmp.eq.s32.totalorder %v51_v8, %v787_v12  ;;  %vm65_vm4 = vcmp.eq.s32.totalorder %v52_v9, %v787_v12  ;;  %v86_v18 = vadd.s32 80, %v1189_v3  ;;  %560 = vperm.xlu1 %1101, %v542_v38   ;;  %v750_v42 = vld [vmem:[%s1391_s11] sm:$0xff]  ;;  %v343_v58 = vld [vmem:[%s1386_s5 + $0x18] sm:$0xff] }
   0xa   :  { %1037 = vmatprep.subr.msk.bf16.mxu1 %vm1036_vm6, %v1106_v13  ;;  %vm1016_vm1 = vmpackc.low %vm61_vm10, %vm60_vm9  ;;  %vm105_vm7 = vcmp.eq.s32.totalorder %v84_v15, %v1184_v1  ;;  %v87_v19 = vadd.s32 88, %v1189_v3  ;;  %vm66_vm9 = vcmp.eq.s32.totalorder %v53_v10, %v787_v12  ;;  %vm67_vm10 = vcmp.eq.s32.totalorder %v54_v11, %v787_v12  ;;  %v763_v43 = vld [vmem:[#allocation2] sm:$0x1]  ;;  %v337_v60 = vld [vmem:[%s1392_s4 + $0x8] sm:$0xff] }
   0xb   :  { %vm1228_vm2 = vmpackc.low %vm104_vm13, %vm103_vm12  ;;  %1017 = vmatprep.subr.msk.bf16.mxu0 %vm1016_vm1, %v1106_v13  ;;  %vm107_vm13 = vcmp.eq.s32.totalorder %v86_v18, %v1184_v1  ;;  %v88_v22 = vadd.s32 96, %v1189_v3  ;;  %v89_v23 = vadd.s32 104, %v1189_v3  ;;  %v90_v24 = vadd.s32 112, %v1189_v3  ;;  %550 = vperm.xlu0 %1100, %v540_v37   ;;  %v336_v59 = vld [vmem:[%s1392_s4] sm:$0xff]  ;;  %v338_v61 = vld [vmem:[%s1392_s4 + $0x10] sm:$0xff] }
   0xc   :  { %1019 = vmatpush3.bf16.msk.msra.mxu0 %vm1016_vm1, %v1106_v13  ;;  %vm1020_vm5 = vmpackc.low %vm63_vm15, %vm62_vm14  ;;  %v91_v25 = vadd.s32 120, %v1189_v3  ;;  %v339_v62 = vld [vmem:[%s1392_s4 + $0x18] sm:$0xff]  ;;  %v571_v63 = vld [vmem:[%s1393_s7] sm:$0xff] }
   0xd   :  { %1039 = vmatpush3.bf16.msk.msra.mxu1 %vm1036_vm6, %v1106_v13  ;;  %vm106_vm6 = vcmp.eq.s32.totalorder %v85_v16, %v1184_v1  ;;  %1021 = vmatprep.subr.msk.bf16.mxu0 %vm1020_vm5, %v1106_v13  ;;  %vm1242_vm8 = vmpackc.low %vm65_vm4, %vm64_vm3  ;;  %vm109_vm1 = vcmp.eq.s32.totalorder %v88_v22, %v1184_v1  ;;  %vm110_vm3 = vcmp.eq.s32.totalorder %v89_v23, %v1184_v1 }
   0xe   :  { %1041 = vmatprep.subr.msk.bf16.mxu1 %vm1216_vm11, %v1106_v13  ;;  %vm1249_vm12 = vmpackc.low %vm106_vm6, %vm105_vm7  ;;  %vm111_vm4 = vcmp.eq.s32.totalorder %v90_v24, %v1184_v1  ;;  %vm344_vm6 = vcmask 261120   ;;  %582 = vperm.xlu1 %1101, %v574_v40  }
   0xf   :  { %vm1028_vm14 = vmpackc.low %vm67_vm10, %vm66_vm9  ;;  %577 = vperm.xlu0 %1100, %v573_v39  }
  0x10   :  { %1023 = vmatpush3.bf16.msk.msra.mxu0 %vm1020_vm5, %v1106_v13  ;;  %vm112_vm5 = vcmp.eq.s32.totalorder %v91_v25, %v1184_v1 }
  0x11   :  { %1043 = vmatpush3.bf16.msk.msra.mxu1 %vm1216_vm11, %v1106_v13  ;;  %vm108_vm11 = vcmp.eq.s32.totalorder %v87_v19, %v1184_v1  ;;  %1025 = vmatprep.subr.msk.bf16.mxu0 %vm1242_vm8, %v1106_v13  ;;  %vm1060_vm7 = vmpackc.low %vm112_vm5, %vm111_vm4  ;;  %v572_v19 = vld [vmem:[%s1393_s7 + $0x8] sm:$0xff] }
  0x12   :  { %1045 = vmatprep.subr.msk.bf16.mxu1 %vm1228_vm2, %v1106_v13  ;;  %vm1052_vm15 = vmpackc.low %vm108_vm11, %vm107_vm13  ;;  %753 = vperm.xlu1 %1101, %v750_v42   ;;  %v771_v42 = vsub.s32 0, %v1189_v3 }
  0x13   :  { %672 = vperm.xlu0 %1100, %v669_v41  }
  0x14   :  { %1027 = vmatpush3.bf16.msk.msra.mxu0 %vm1242_vm8, %v1106_v13  ;;  %vm675_vm8 = vcmask 130048  }
  0x15   :  { %1047 = vmatpush3.bf16.msk.msra.mxu1 %vm1228_vm2, %v1106_v13  ;;  %1029 = vmatprep.subr.msk.bf16.mxu0 %vm1028_vm14, %v1106_v13  ;;  %vm1056_vm2 = vmpackc.low %vm110_vm3, %vm109_vm1 }
  0x16   :  { %1049 = vmatprep.subr.msk.bf16.mxu1 %vm1249_vm12, %v1106_v13 }
  0x17   :  { %766 = vperm.xlu0 %1100, %v763_v43  }
  0x18   :  { %1031 = vmatpush3.bf16.msk.msra.mxu0 %vm1028_vm14, %v1106_v13 }
  0x19   :  { %1051 = vmatpush3.bf16.msk.msra.mxu1 %vm1249_vm12, %v1106_v13 }
  0x1a   :  { %1053 = vmatprep.subr.msk.bf16.mxu1 %vm1052_vm15, %v1106_v13 }
  0x1b   :  { %927 = vmatmul.mubr.msk.f32.vlgmr.msra.gmra.mrb[0].mxu0 %vm149_vm0, %v146_v26 }
  0x1c   :  { %929 = vmatprep.mubr.msk.f32.mxu0 %vm149_vm0, %v147_v27 }
  0x1d   :  { %1055 = vmatpush3.bf16.msk.msra.mxu1 %vm1052_vm15, %v1106_v13 }
  0x1e   :  { %1057 = vmatprep.subr.msk.bf16.mxu1 %vm1056_vm2, %v1106_v13 }
  0x1f   :  { %930 = vmatmul.mubr.msk.f32.gmra.mrb[2].mxu0 %vm149_vm0, %v148_v28  ;;  %vm1109_vm0 = vmmov 0  }
  0x20   :  { %978 = vmatprep.mubr.msk.f32.mxu0 %vm344_vm6, %v340_v32 }
  0x21   :  { %1059 = vmatpush3.bf16.msk.msra.mxu1 %vm1056_vm2, %v1106_v13 }
  0x22   :  { %1061 = vmatprep.subr.msk.bf16.mxu1 %vm1060_vm7, %v1106_v13 }
  0x25   :  { %1063 = vmatpush3.bf16.msk.msra.mxu1 %vm1060_vm7, %v1106_v13 }
  0x26   :  { %1088 = vmatprep.subr.bf16.mxu1 %v1108_v20 }
  0x28   :  { %965 = vmatmul.mubr.f32.vlgmr.msra.gmra.mrb[0].mxu1 %v248_v29 }
  0x29   :  { %967 = vmatprep.mubr.f32.mxu1 %v249_v30 }
  0x2c   :  { %968 = vmatmul.mubr.f32.gmra.mrb[2].mxu1 %v250_v31  ;;  %v668_v31 = vld [vmem:[%s1394_s9] sm:$0xff] }
  0x2d   :  { %1013 = vmatprep.mubr.msk.f32.mxu1 %vm1109_vm0, %v1110_v21 }
  0x84   :  { %v556_v1 = vpop.permute.xlu1 %555 }
  0x86   :  { %v546_v0 = vpop.permute.xlu0 %545 }
  0x88   :  { %v561_v9 = vpop.permute.xlu1 %560 }
  0x8a   :  { %v551_v2 = vpop.permute.xlu0 %550 }
  0x8d   :  { %v583_v22 = vpop.permute.xlu1 %582 }
  0x8e   :  { %v578_v24 = vpop.permute.xlu0 %577 }
  0x91   :  { %v754_v37 = vpop.permute.xlu1 %753 }
  0x92   :  { %v673_v32 = vpop.permute.xlu0 %672 }
  0xee   :  { %v928_v44 = vpop.f32.mrb[0].mxu0 }
  0xef   :  { %v228_v45 = vpop.f32.mrb[1].mxu0 }
  0xf0   :  { %v1072_v46 = vpack.c.bf16 %v928_v44, %v228_v45  ;;  %v767_v44 = vpop.permute.xlu0 %766 }
  0xf2   :  { %v931_v47 = vpop.f32.mrb[2].mxu0 }
  0xf3   :  { %v238_v48 = vpop.f32.mrb[3].mxu0 }
  0xf4   :  { %v1076_v49 = vpack.c.bf16 %v931_v47, %v238_v48 }
  0xfb   :  { %v966_v50 = vpop.f32.mrb[0].mxu1 }
  0xfc   :  { %v317_v51 = vpop.f32.mrb[1].mxu1 }
  0xfd   :  { %v1064_v52 = vpack.c.bf16 %v966_v50, %v317_v51 }
  0xff   :  { %v969_v53 = vpop.f32.mrb[2].mxu1  ;;  %1065 = vmatprep.subr.bf16.mxu0 %v1064_v52 }
 0x100   :  { %v327_v54 = vpop.f32.mrb[3].mxu1  ;;  %1067 = vmatpush3.bf16.msra.mxu0 %v1064_v52 }
 0x101   :  { %v1068_v55 = vpack.c.bf16 %v969_v53, %v327_v54 }
 0x103   :  { %1069 = vmatprep.subr.bf16.mxu0 %v1068_v55 }
 0x104   :  { %1071 = vmatpush3.bf16.msra.mxu0 %v1068_v55 }
 0x105   :  { %1073 = vmatprep.subr.bf16.mxu0 %v1072_v46 }
 0x107   :  { %979 = vmatmul.mubr.msk.f32.vlgmr.msra.gmra.mrb[4].mxu0 %vm344_vm6, %v341_v56 }
 0x108   :  { %1075 = vmatpush3.bf16.msra.mxu0 %v1072_v46  ;;  %981 = vmatprep.mubr.msk.f32.mxu0 %vm344_vm6, %v342_v57  ;;  %v772_v46 = vrot.slane %v767_v44, %v771_v42 }
 0x109   :  { %1077 = vmatprep.subr.bf16.mxu0 %v1076_v49 }
 0x10b   :  { %982 = vmatmul.mubr.msk.f32.gmra.mrb[6].mxu0 %vm344_vm6, %v343_v58 }
 0x10c   :  { %1079 = vmatpush3.bf16.msra.mxu0 %v1076_v49  ;;  %992 = vmatprep.mubr.msk.f32.mxu0 %vm344_vm6, %v336_v59 }
 0x10f   :  { %993 = vmatmul.mubr.msk.f32.vlgmr.msra.gmra.mrb[4].mxu0 %vm344_vm6, %v337_v60 }
 0x110   :  { %995 = vmatprep.mubr.msk.f32.mxu0 %vm344_vm6, %v338_v61 }
 0x113   :  { %996 = vmatmul.mubr.msk.f32.gmra.mrb[6].mxu0 %vm344_vm6, %v339_v62 }
 0x114   :  { %1006 = vmatprep.mubr.msk.f32.mxu0 %vm344_vm6, %v571_v63 }
 0x1e2   :  { %v994_v4 = vpop.f32.mrb[4].mxu0 }
 0x1e3   :  { %v564_v5 = vadd.f32 %v994_v4, %v551_v2  ;;  %v520_v6 = vpop.f32.mrb[5].mxu0 }
 0x1e4   :  { %v563_v7 = vadd.f32 %v546_v0, %v520_v6 }
 0x1e5   :  { %v568_v8 = vmax.f32 %v564_v5, 0.0 }
 0x1e6   :  { %v567_v10 = vmax.f32 %v563_v7, 0.0  ;;  %v997_v11 = vpop.f32.mrb[6].mxu0 }
 0x1e7   :  { %v566_v12 = vadd.f32 %v997_v11, %v561_v9  ;;  %v530_v13 = vpop.f32.mrb[7].mxu0 }
 0x1e8   :  { %v1080_v14 = vpack.c.bf16 %v568_v8, %v567_v10  ;;  %v565_v15 = vadd.f32 %v556_v1, %v530_v13 }
 0x1e9   :  { %v570_v16 = vmax.f32 %v566_v12, 0.0 }
 0x1ea   :  { %v569_v17 = vmax.f32 %v565_v15, 0.0  ;;  %1081 = vmatprep.subr.bf16.mxu0 %v1080_v14 }
 0x1eb   :  { %1083 = vmatpush3.bf16.msra.mxu0 %v1080_v14 }
 0x1ec   :  { %v1084_v18 = vpack.c.bf16 %v570_v16, %v569_v17 }
 0x1ee   :  { %1085 = vmatprep.subr.bf16.mxu0 %v1084_v18 }
 0x1ef   :  { %1087 = vmatpush3.bf16.msra.mxu0 %v1084_v18 }
 0x1f2   :  { %1007 = vmatmul.mubr.msk.f32.vlgmr.msra.gmra.mrb[8].mxu0 %vm344_vm6, %v572_v19 }
 0x2c5   :  { %v1008_v23 = vpop.f32.mrb[8].mxu0 }
 0x2c6   :  { %v663_v25 = vadd.f32 %v1008_v23, %v583_v22  ;;  %v657_v26 = vpop.f32.mrb[9].mxu0 }
 0x2c7   :  { %v658_v27 = vadd.f32 %v657_v26, %v578_v24 }
 0x2c8   :  { %v667_v28 = vmax.f32 %v663_v25, 0.0 }
 0x2c9   :  { %v666_v29 = vmax.f32 %v658_v27, 0.0 }
 0x2cb   :  { %v1089_v30 = vpack.c.bf16 %v667_v28, %v666_v29 }
 0x2cd   :  { %1090 = vmatpush3.bf16.msra.mxu1 %v1089_v30 }
 0x2d0   :  { %1014 = vmatmul.mubr.msk.f32.vlgmr.msra.gmra.mrb[4].mxu1 %vm675_vm8, %v668_v31 }
 0x3a3   :  { %v745_v33 = vpop.f32.mrb[4].mxu1 }
 0x3a4   :  { %v746_v34 = vadd.f32 %v745_v33, %v673_v32  ;;  %v1015_v35 = vpop.f32.mrb[5].mxu1 }
 0x3a6   :  { %v749_v36 = vmax.f32 %v746_v34, 0.0 }
 0x3a8   :  { %v756_v38 = vmul.f32 %v754_v37, %v749_v36 }
 0x3aa   :  { %v757_v39 = vrot.slane %v756_v38, 4 }
 0x3ac   :  { %v758_v40 = vadd.f32 %v757_v39, %v756_v38 }
 0x3ae   :  { %v759_v41 = vrot.slane %v758_v40, 2 }
 0x3b0   :  { %v760_v43 = vadd.f32 %v759_v41, %v758_v40 }
 0x3b2   :  { %v761_v45 = vrot.slane %v760_v43, 1 }
 0x3b4   :  { %v762_v47 = vadd.f32 %v761_v45, %v760_v43 }
 0x3b6   :  { %v773_v48 = vadd.f32 %v772_v46, %v762_v47 }
 0x3b8   :  { %v852_v49 = vmul.f32 -1.442695, %v773_v48 }
 0x3ba   :  { %1102 = vpow2.f32 %v852_v49 }
 0x3c4   :  { %v1103_v50 = vpop.eup %1102 }
 0x3c5   :  { %v777_v51 = vadd.f32 1.0, %v1103_v50 }
 0x3c7   :  { %1104 = vrcp.f32 %v777_v51 }
 0x3d1   :  { %v1105_v52 = vpop.eup %1104 }
 0x3d2   :  { %v780_v53 = vmul.f32 5.0, %v1105_v52 }
 0x3d4   :  { %v781_v54 = vadd.f32 1.0, %v780_v53 }
 0x3d6   :  { %782 = vst [vmem:[%s1395_s13] sm:$0x1] %v781_v54 }

</bundles_post_ra>
